<compile_context>
chip_gen: v5e
topology: v5e:2x2
jax: 0.10.0
libtpu: 0.0.40
codegen_flags: <defaults>
</compile_context>

<pallas_src>
import functools

import jax
import jax.numpy as jnp
from jax.experimental import pallas as pl
from jax.experimental.pallas import tpu as pltpu


def _round_up(n, m):
    return ((n + m - 1) // m) * m


def _vmem_limit_bytes():
    """Generation-aware VMEM limit with ~25% headroom for pipeline buffers."""
    cap = 128 * 1024 * 1024  # v5e/v6e default
    try:
        info = pltpu.get_tpu_info()
        cap = int(getattr(info, "vmem_capacity_bytes", cap))
    except Exception:
        pass
    return min(100 * 1024 * 1024, int(cap * 3 // 4))


# ---------------------------------------------------------------------------
# Pallas kernel: fully fused MLP stack (matmul + bias + activation per layer)
# ---------------------------------------------------------------------------
def _fused_mlp_kernel(x_ref, *refs, activations):
    # refs = (w0, b0, w1, b1, ..., w_{n-1}, b_{n-1}, out)
    n_layers = len(activations)
    o_ref = refs[-1]
    h = x_ref[...]  # (TB, D0_pad) f32, stays in vregs/VMEM throughout
    for i in range(n_layers):
        w_ref = refs[2 * i]
        b_ref = refs[2 * i + 1]
        # bf16 operands for the MXU, f32 accumulation.
        y = jnp.dot(h.astype(jnp.bfloat16), w_ref[...],
                    preferred_element_type=jnp.float32)
        y = y + b_ref[...]  # (1, D_pad) f32 broadcast over batch rows
        act = activations[i]
        if act == "relu":
            y = jnp.maximum(y, 0.0)
        elif act == "sigmoid":
            # 1 / (1 + exp(-y)): exp on EUP, approx reciprocal on EUP too.
            y = pl.reciprocal(1.0 + jnp.exp(-y), approx=True)
        elif act == "identity":
            pass
        else:
            raise ValueError(f"unknown activation: {act}")
        h = y
    o_ref[...] = h.astype(o_ref.dtype)


def fused_mlp(x, layers, activations, *, tb=None):
    """Single-kernel forward of a stack of dense layers.

    x:       (B, D0)   float32 (unpadded)
    layers:  list of (w_pad bf16, b_pad f32 (1, dout)) with 128-multiple dims
    activations: tuple of activation names, one per layer
    """
    B, in_dim = x.shape
    d0_pad = layers[0][0].shape[0]
    d_last_pad = layers[-1][0].shape[1]
    assert in_dim <= d0_pad

    # ---- batch tiling ----
    # Small batches: one tile (no split, no per-step overhead).
    # Larger batches: tiles <= 256 rows, targeting an even step count >= 4 so
    # the auto-pipeline hides x-in / out-writeback DMA and both v7x TCs work.
    if tb is None:
        if B <= 8:
            tb = _round_up(max(B, 1), 8)
        else:
            target_steps = max(4, pl.cdiv(B, 256))
            if target_steps % 2:
                target_steps += 1
            tb = _round_up(pl.cdiv(B, target_steps), 8)
            tb = max(8, min(tb, 256))
    assert tb % 8 == 0, "batch tile must be a multiple of 8 (sublane)"
    b_pad = _round_up(B, tb)

    # Pad batch rows / feature cols only when actually needed.
    if b_pad == B and d0_pad == in_dim:
        x_pad = x
    else:
        x_pad = jnp.pad(x, ((0, b_pad - B), (0, d0_pad - in_dim)))

    flat_inputs = [x_pad]
    for (w, b) in layers:
        flat_inputs.append(w)
        flat_inputs.append(b)

    kernel = functools.partial(_fused_mlp_kernel, activations=tuple(activations))
    compiler_params = pltpu.CompilerParams(
        dimension_semantics=("parallel",),
        vmem_limit_bytes=_vmem_limit_bytes(),
    )

    def _make_call(single_buffer_weights):
        in_specs = [pl.BlockSpec((tb, d0_pad), lambda i: (i, 0))]  # x tile
        for (w, b) in layers:
            din, dout = w.shape
            if single_buffer_weights:
                # Constant block index -> no re-fetch between grid steps, so
                # single-buffer them to halve resident weight VMEM.
                in_specs.append(pl.BlockSpec((din, dout), lambda i: (0, 0),
                                             pipeline_mode=pl.Buffered(1)))
                in_specs.append(pl.BlockSpec((1, dout), lambda i: (0, 0),
                                             pipeline_mode=pl.Buffered(1)))
            else:
                in_specs.append(pl.BlockSpec((din, dout), lambda i: (0, 0)))
                in_specs.append(pl.BlockSpec((1, dout), lambda i: (0, 0)))
        return pl.pallas_call(
            kernel,
            out_shape=jax.ShapeDtypeStruct((b_pad, d_last_pad), jnp.float32),
            grid_spec=pltpu.PrefetchScalarGridSpec(
                num_scalar_prefetch=0,
                grid=(b_pad // tb,),
                in_specs=in_specs,
                out_specs=pl.BlockSpec((tb, d_last_pad), lambda i: (i, 0)),
            ),
            compiler_params=compiler_params,
        )

    try:
        out_pad = _make_call(True)(*flat_inputs)
    except Exception:
        # pl.Buffered(1) not supported on this jax/libtpu combo -> default
        # double-buffered specs (functionally identical).
        out_pad = _make_call(False)(*flat_inputs)
    return out_pad


# ---------------------------------------------------------------------------
# Structure: encoder + decoder stacks of (dense + activation) layers
# ---------------------------------------------------------------------------
def init_structure_params(key, encoder_layers, decoder_layers):
    """Deterministic parameter init (shapes dictated by the layer dims)."""
    params = {"encoder": [], "decoder": []}

    def make_layer(k, fan_in, fan_out):
        kw, kb = jax.random.split(k)
        scale = 1.0 / jnp.sqrt(jnp.float32(fan_in))
        w = jax.random.uniform(kw, (fan_in, fan_out), jnp.float32, -scale, scale)
        b = jax.random.uniform(kb, (fan_out,), jnp.float32, -scale, scale)
        return w, b

    n_enc = len(encoder_layers) - 1
    n_dec = len(decoder_layers) - 1
    keys = jax.random.split(key, n_enc + n_dec)
    for i in range(n_enc):
        params["encoder"].append(
            make_layer(keys[i], encoder_layers[i], encoder_layers[i + 1]))
    for i in range(n_dec):
        params["decoder"].append(
            make_layer(keys[n_enc + i], decoder_layers[i], decoder_layers[i + 1]))
    return params


def pad_structure_params(params, *, activation="relu",
                         output_activation="sigmoid", lane=128):
    """Flatten encoder+decoder into one layer list, zero-pad all feature dims
    to lane-dense multiples of 128, store weights in bf16 (MXU-native) and
    biases as f32 (1, dout) rows.  Done once, outside the hot path."""
    raw_layers = list(params["encoder"]) + list(params["decoder"])
    n_layers = len(raw_layers)

    padded = []
    for (w, b) in raw_layers:
        din, dout = w.shape
        din_p = _round_up(din, lane)
        dout_p = _round_up(dout, lane)
        w_p = jnp.pad(w, ((0, din_p - din), (0, dout_p - dout)))
        w_p = w_p.astype(jnp.bfloat16)                 # MXU operand dtype
        b_p = jnp.pad(b, ((0, dout_p - dout),)).astype(jnp.float32)
        padded.append((w_p, b_p.reshape(1, dout_p)))   # reshape once at init

    activations = tuple(
        [activation] * (n_layers - 1) + [output_activation])
    return {
        "layers": padded,
        "activations": activations,
        "in_dim": raw_layers[0][0].shape[0],
        "out_dim": raw_layers[-1][0].shape[1],
    }


def structure_forward(padded_params, x, *, tb=None):
    """decoder(encoder(x)) — one fused Pallas kernel."""
    B = x.shape[0]
    out_dim = padded_params["out_dim"]
    out_pad = fused_mlp(x, padded_params["layers"],
                        padded_params["activations"], tb=tb)
    if out_pad.shape == (B, out_dim):
        return out_pad  # already aligned, skip the extra HBM pass
    return out_pad[:B, :out_dim]


# ---------------------------------------------------------------------------
# Pure-JAX reference for a correctness sanity check.
# ---------------------------------------------------------------------------
def structure_forward_ref(params, x):
    h = x
    for (w, b) in params["encoder"]:
        h = jnp.maximum(h @ w + b, 0.0)
    dec = params["decoder"]
    for (w, b) in dec[:-1]:
        h = jnp.maximum(h @ w + b, 0.0)
    w, b = dec[-1]
    return jax.nn.sigmoid(h @ w + b)


if __name__ == "__main__":
    key = jax.random.PRNGKey(0)
    k_param, k_x = jax.random.split(key)

    # Small shapes consistent with the module: autoencoder 16 -> 32 -> 8 -> 32 -> 16.
    encoder_layers = [16, 32, 8]
    decoder_layers = [8, 32, 16]
    batch = 8

    params = init_structure_params(k_param, encoder_layers, decoder_layers)
    padded_params = pad_structure_params(params)
    x = jax.random.normal(k_x, (batch, encoder_layers[0]), jnp.float32)

    out = structure_forward(padded_params, x)
    out = jax.block_until_ready(out)

    ref = structure_forward_ref(params, x)
    assert out.shape == (batch, decoder_layers[-1])
    # bf16 matmul operands + approx reciprocal -> looser tolerance than f32.
    assert jnp.allclose(out, ref, atol=3e-2, rtol=3e-2), "mismatch vs reference"

    print("KERNEL_OK")
</pallas_src>

<mosaic_0001>
module attributes {stable_mosaic.version = 11 : i64} {
  func.func @_fused_mlp_kernel(%arg0: i32, %arg1: memref<8x128xf32, #tpu.memory_space<vmem>>, %arg2: memref<128x128xbf16, #tpu.memory_space<vmem>>, %arg3: memref<1x128xf32, #tpu.memory_space<vmem>>, %arg4: memref<128x128xbf16, #tpu.memory_space<vmem>>, %arg5: memref<1x128xf32, #tpu.memory_space<vmem>>, %arg6: memref<128x128xbf16, #tpu.memory_space<vmem>>, %arg7: memref<1x128xf32, #tpu.memory_space<vmem>>, %arg8: memref<128x128xbf16, #tpu.memory_space<vmem>>, %arg9: memref<1x128xf32, #tpu.memory_space<vmem>>, %arg10: memref<8x128xf32, #tpu.memory_space<vmem>>) attributes {dimension_semantics = [#tpu.dimension_semantics<parallel>], iteration_bounds = array<i64: 1>, scalar_prefetch = 0 : i64, scratch_operands = 0 : i64, tpu.core_type = #tpu.core_type<tc>, window_params = [{transform_indices = @transform_0, window_bounds = array<i64: 8, 128>}, {pipeline_mode = #tpu.pipeline_mode<synchronous>, transform_indices = @transform_1, window_bounds = array<i64: 128, 128>}, {pipeline_mode = #tpu.pipeline_mode<synchronous>, transform_indices = @transform_2, window_bounds = array<i64: 1, 128>}, {pipeline_mode = #tpu.pipeline_mode<synchronous>, transform_indices = @transform_3, window_bounds = array<i64: 128, 128>}, {pipeline_mode = #tpu.pipeline_mode<synchronous>, transform_indices = @transform_4, window_bounds = array<i64: 1, 128>}, {pipeline_mode = #tpu.pipeline_mode<synchronous>, transform_indices = @transform_5, window_bounds = array<i64: 128, 128>}, {pipeline_mode = #tpu.pipeline_mode<synchronous>, transform_indices = @transform_6, window_bounds = array<i64: 1, 128>}, {pipeline_mode = #tpu.pipeline_mode<synchronous>, transform_indices = @transform_7, window_bounds = array<i64: 128, 128>}, {pipeline_mode = #tpu.pipeline_mode<synchronous>, transform_indices = @transform_8, window_bounds = array<i64: 1, 128>}, {transform_indices = @transform_9, window_bounds = array<i64: 8, 128>}]} {
    %c0 = arith.constant 0 : index
    %c0_0 = arith.constant 0 : index
    %0 = vector.load %arg1[%c0, %c0_0] : memref<8x128xf32, #tpu.memory_space<vmem>>, vector<8x128xf32>
    %1 = arith.truncf %0 : vector<8x128xf32> to vector<8x128xbf16>
    %c0_1 = arith.constant 0 : index
    %c0_2 = arith.constant 0 : index
    %2 = vector.load %arg2[%c0_1, %c0_2] : memref<128x128xbf16, #tpu.memory_space<vmem>>, vector<128x128xbf16>
    %cst = arith.constant dense<0.000000e+00> : vector<8x128xf32>
    %3 = tpu.matmul %1, %2, %cst {dimension_numbers = #tpu.dot_dimension_numbers<[1], [0], [0], [1], [0, 0, 1, 1], [], []>} : vector<8x128xbf16>, vector<128x128xbf16>, vector<8x128xf32> -> vector<8x128xf32>
    %c0_3 = arith.constant 0 : index
    %c0_4 = arith.constant 0 : index
    %4 = vector.load %arg3[%c0_3, %c0_4] : memref<1x128xf32, #tpu.memory_space<vmem>>, vector<1x128xf32>
    %5 = vector.broadcast %4 : vector<1x128xf32> to vector<8x128xf32>
    %6 = arith.addf %3, %5 : vector<8x128xf32>
    %cst_5 = arith.constant 0.000000e+00 : f32
    %7 = vector.broadcast %cst_5 : f32 to vector<8x128xf32>
    %8 = arith.maximumf %6, %7 : vector<8x128xf32>
    %9 = arith.truncf %8 : vector<8x128xf32> to vector<8x128xbf16>
    %c0_6 = arith.constant 0 : index
    %c0_7 = arith.constant 0 : index
    %10 = vector.load %arg4[%c0_6, %c0_7] : memref<128x128xbf16, #tpu.memory_space<vmem>>, vector<128x128xbf16>
    %cst_8 = arith.constant dense<0.000000e+00> : vector<8x128xf32>
    %11 = tpu.matmul %9, %10, %cst_8 {dimension_numbers = #tpu.dot_dimension_numbers<[1], [0], [0], [1], [0, 0, 1, 1], [], []>} : vector<8x128xbf16>, vector<128x128xbf16>, vector<8x128xf32> -> vector<8x128xf32>
    %c0_9 = arith.constant 0 : index
    %c0_10 = arith.constant 0 : index
    %12 = vector.load %arg5[%c0_9, %c0_10] : memref<1x128xf32, #tpu.memory_space<vmem>>, vector<1x128xf32>
    %13 = vector.broadcast %12 : vector<1x128xf32> to vector<8x128xf32>
    %14 = arith.addf %11, %13 : vector<8x128xf32>
    %cst_11 = arith.constant 0.000000e+00 : f32
    %15 = vector.broadcast %cst_11 : f32 to vector<8x128xf32>
    %16 = arith.maximumf %14, %15 : vector<8x128xf32>
    %17 = arith.truncf %16 : vector<8x128xf32> to vector<8x128xbf16>
    %c0_12 = arith.constant 0 : index
    %c0_13 = arith.constant 0 : index
    %18 = vector.load %arg6[%c0_12, %c0_13] : memref<128x128xbf16, #tpu.memory_space<vmem>>, vector<128x128xbf16>
    %cst_14 = arith.constant dense<0.000000e+00> : vector<8x128xf32>
    %19 = tpu.matmul %17, %18, %cst_14 {dimension_numbers = #tpu.dot_dimension_numbers<[1], [0], [0], [1], [0, 0, 1, 1], [], []>} : vector<8x128xbf16>, vector<128x128xbf16>, vector<8x128xf32> -> vector<8x128xf32>
    %c0_15 = arith.constant 0 : index
    %c0_16 = arith.constant 0 : index
    %20 = vector.load %arg7[%c0_15, %c0_16] : memref<1x128xf32, #tpu.memory_space<vmem>>, vector<1x128xf32>
    %21 = vector.broadcast %20 : vector<1x128xf32> to vector<8x128xf32>
    %22 = arith.addf %19, %21 : vector<8x128xf32>
    %cst_17 = arith.constant 0.000000e+00 : f32
    %23 = vector.broadcast %cst_17 : f32 to vector<8x128xf32>
    %24 = arith.maximumf %22, %23 : vector<8x128xf32>
    %25 = arith.truncf %24 : vector<8x128xf32> to vector<8x128xbf16>
    %c0_18 = arith.constant 0 : index
    %c0_19 = arith.constant 0 : index
    %26 = vector.load %arg8[%c0_18, %c0_19] : memref<128x128xbf16, #tpu.memory_space<vmem>>, vector<128x128xbf16>
    %cst_20 = arith.constant dense<0.000000e+00> : vector<8x128xf32>
    %27 = tpu.matmul %25, %26, %cst_20 {dimension_numbers = #tpu.dot_dimension_numbers<[1], [0], [0], [1], [0, 0, 1, 1], [], []>} : vector<8x128xbf16>, vector<128x128xbf16>, vector<8x128xf32> -> vector<8x128xf32>
    %c0_21 = arith.constant 0 : index
    %c0_22 = arith.constant 0 : index
    %28 = vector.load %arg9[%c0_21, %c0_22] : memref<1x128xf32, #tpu.memory_space<vmem>>, vector<1x128xf32>
    %29 = vector.broadcast %28 : vector<1x128xf32> to vector<8x128xf32>
    %30 = arith.addf %27, %29 : vector<8x128xf32>
    %cst_23 = arith.constant 0.000000e+00 : f32
    %31 = vector.broadcast %cst_23 : f32 to vector<8x128xf32>
    %32 = arith.subf %31, %30 : vector<8x128xf32>
    %33 = math.exp %32 : vector<8x128xf32>
    %cst_24 = arith.constant 1.000000e+00 : f32
    %34 = vector.broadcast %cst_24 : f32 to vector<8x128xf32>
    %35 = arith.addf %34, %33 : vector<8x128xf32>
    %36 = tpu.reciprocal %35 {approx = true} : vector<8x128xf32> -> vector<8x128xf32>
    %c0_25 = arith.constant 0 : index
    %c0_26 = arith.constant 0 : index
    %37 = vector.load %arg10[%c0_25, %c0_26] : memref<8x128xf32, #tpu.memory_space<vmem>>, vector<8x128xf32>
    tpu.vector_store %arg10[%c0_25, %c0_26], %36 {strides = array<i32>} : memref<8x128xf32, #tpu.memory_space<vmem>>, vector<8x128xf32>,
    return
  }
  func.func @transform_0(%arg0: i32) -> (i32, i32) {
    %c0_i32 = arith.constant 0 : i32
    %c0_i32_0 = arith.constant 0 : i32
    return %arg0, %c0_i32 : i32, i32
  }
  func.func @transform_1(%arg0: i32) -> (i32, i32) {
    %c0_i32 = arith.constant 0 : i32
    %c0_i32_0 = arith.constant 0 : i32
    %c0_i32_1 = arith.constant 0 : i32
    return %c0_i32, %c0_i32_0 : i32, i32
  }
  func.func @transform_2(%arg0: i32) -> (i32, i32) {
    %c0_i32 = arith.constant 0 : i32
    %c0_i32_0 = arith.constant 0 : i32
    %c0_i32_1 = arith.constant 0 : i32
    return %c0_i32, %c0_i32_0 : i32, i32
  }
  func.func @transform_3(%arg0: i32) -> (i32, i32) {
    %c0_i32 = arith.constant 0 : i32
    %c0_i32_0 = arith.constant 0 : i32
    %c0_i32_1 = arith.constant 0 : i32
    return %c0_i32, %c0_i32_0 : i32, i32
  }
  func.func @transform_4(%arg0: i32) -> (i32, i32) {
    %c0_i32 = arith.constant 0 : i32
    %c0_i32_0 = arith.constant 0 : i32
    %c0_i32_1 = arith.constant 0 : i32
    return %c0_i32, %c0_i32_0 : i32, i32
  }
  func.func @transform_5(%arg0: i32) -> (i32, i32) {
    %c0_i32 = arith.constant 0 : i32
    %c0_i32_0 = arith.constant 0 : i32
    %c0_i32_1 = arith.constant 0 : i32
    return %c0_i32, %c0_i32_0 : i32, i32
  }
  func.func @transform_6(%arg0: i32) -> (i32, i32) {
    %c0_i32 = arith.constant 0 : i32
    %c0_i32_0 = arith.constant 0 : i32
    %c0_i32_1 = arith.constant 0 : i32
    return %c0_i32, %c0_i32_0 : i32, i32
  }
  func.func @transform_7(%arg0: i32) -> (i32, i32) {
    %c0_i32 = arith.constant 0 : i32
    %c0_i32_0 = arith.constant 0 : i32
    %c0_i32_1 = arith.constant 0 : i32
    return %c0_i32, %c0_i32_0 : i32, i32
  }
  func.func @transform_8(%arg0: i32) -> (i32, i32) {
    %c0_i32 = arith.constant 0 : i32
    %c0_i32_0 = arith.constant 0 : i32
    %c0_i32_1 = arith.constant 0 : i32
    return %c0_i32, %c0_i32_0 : i32, i32
  }
  func.func @transform_9(%arg0: i32) -> (i32, i32) {
    %c0_i32 = arith.constant 0 : i32
    %c0_i32_0 = arith.constant 0 : i32
    return %arg0, %c0_i32 : i32, i32
  }
}

module attributes {stable_mosaic.version = 11 : i64} {
  func.func @_fused_mlp_kernel(%arg0: i32, %arg1: memref<8x128xf32, #tpu.memory_space<vmem>>, %arg2: memref<128x128xbf16, #tpu.memory_space<vmem>>, %arg3: memref<1x128xf32, #tpu.memory_space<vmem>>, %arg4: memref<128x128xbf16, #tpu.memory_space<vmem>>, %arg5: memref<1x128xf32, #tpu.memory_space<vmem>>, %arg6: memref<128x128xbf16, #tpu.memory_space<vmem>>, %arg7: memref<1x128xf32, #tpu.memory_space<vmem>>, %arg8: memref<128x128xbf16, #tpu.memory_space<vmem>>, %arg9: memref<1x128xf32, #tpu.memory_space<vmem>>, %arg10: memref<8x128xf32, #tpu.memory_space<vmem>>) attributes {dimension_semantics = [#tpu.dimension_semantics<parallel>], iteration_bounds = array<i64: 1>, scalar_prefetch = 0 : i64, scratch_operands = 0 : i64, tpu.core_type = #tpu.core_type<tc>, window_params = [{transform_indices = @transform_0, window_bounds = array<i64: 8, 128>}, {pipeline_mode = #tpu.pipeline_mode<synchronous>, transform_indices = @transform_1, window_bounds = array<i64: 128, 128>}, {pipeline_mode = #tpu.pipeline_mode<synchronous>, transform_indices = @transform_2, window_bounds = array<i64: 1, 128>}, {pipeline_mode = #tpu.pipeline_mode<synchronous>, transform_indices = @transform_3, window_bounds = array<i64: 128, 128>}, {pipeline_mode = #tpu.pipeline_mode<synchronous>, transform_indices = @transform_4, window_bounds = array<i64: 1, 128>}, {pipeline_mode = #tpu.pipeline_mode<synchronous>, transform_indices = @transform_5, window_bounds = array<i64: 128, 128>}, {pipeline_mode = #tpu.pipeline_mode<synchronous>, transform_indices = @transform_6, window_bounds = array<i64: 1, 128>}, {pipeline_mode = #tpu.pipeline_mode<synchronous>, transform_indices = @transform_7, window_bounds = array<i64: 128, 128>}, {pipeline_mode = #tpu.pipeline_mode<synchronous>, transform_indices = @transform_8, window_bounds = array<i64: 1, 128>}, {transform_indices = @transform_9, window_bounds = array<i64: 8, 128>}]} {
    %c0 = arith.constant 0 : index
    %c0_0 = arith.constant 0 : index
    %0 = vector.load %arg1[%c0, %c0_0] : memref<8x128xf32, #tpu.memory_space<vmem>>, vector<8x128xf32>
    %1 = arith.truncf %0 : vector<8x128xf32> to vector<8x128xbf16>
    %c0_1 = arith.constant 0 : index
    %c0_2 = arith.constant 0 : index
    %2 = vector.load %arg2[%c0_1, %c0_2] : memref<128x128xbf16, #tpu.memory_space<vmem>>, vector<128x128xbf16>
    %cst = arith.constant dense<0.000000e+00> : vector<8x128xf32>
    %3 = tpu.matmul %1, %2, %cst {dimension_numbers = #tpu.dot_dimension_numbers<[1], [0], [0], [1], [0, 0, 1, 1], [], []>} : vector<8x128xbf16>, vector<128x128xbf16>, vector<8x128xf32> -> vector<8x128xf32>
    %c0_3 = arith.constant 0 : index
    %c0_4 = arith.constant 0 : index
    %4 = vector.load %arg3[%c0_3, %c0_4] : memref<1x128xf32, #tpu.memory_space<vmem>>, vector<1x128xf32>
    %5 = vector.broadcast %4 : vector<1x128xf32> to vector<8x128xf32>
    %6 = arith.addf %3, %5 : vector<8x128xf32>
    %cst_5 = arith.constant 0.000000e+00 : f32
    %7 = vector.broadcast %cst_5 : f32 to vector<8x128xf32>
    %8 = arith.maximumf %6, %7 : vector<8x128xf32>
    %9 = arith.truncf %8 : vector<8x128xf32> to vector<8x128xbf16>
    %c0_6 = arith.constant 0 : index
    %c0_7 = arith.constant 0 : index
    %10 = vector.load %arg4[%c0_6, %c0_7] : memref<128x128xbf16, #tpu.memory_space<vmem>>, vector<128x128xbf16>
    %cst_8 = arith.constant dense<0.000000e+00> : vector<8x128xf32>
    %11 = tpu.matmul %9, %10, %cst_8 {dimension_numbers = #tpu.dot_dimension_numbers<[1], [0], [0], [1], [0, 0, 1, 1], [], []>} : vector<8x128xbf16>, vector<128x128xbf16>, vector<8x128xf32> -> vector<8x128xf32>
    %c0_9 = arith.constant 0 : index
    %c0_10 = arith.constant 0 : index
    %12 = vector.load %arg5[%c0_9, %c0_10] : memref<1x128xf32, #tpu.memory_space<vmem>>, vector<1x128xf32>
    %13 = vector.broadcast %12 : vector<1x128xf32> to vector<8x128xf32>
    %14 = arith.addf %11, %13 : vector<8x128xf32>
    %cst_11 = arith.constant 0.000000e+00 : f32
    %15 = vector.broadcast %cst_11 : f32 to vector<8x128xf32>
    %16 = arith.maximumf %14, %15 : vector<8x128xf32>
    %17 = arith.truncf %16 : vector<8x128xf32> to vector<8x128xbf16>
    %c0_12 = arith.constant 0 : index
    %c0_13 = arith.constant 0 : index
    %18 = vector.load %arg6[%c0_12, %c0_13] : memref<128x128xbf16, #tpu.memory_space<vmem>>, vector<128x128xbf16>
    %cst_14 = arith.constant dense<0.000000e+00> : vector<8x128xf32>
    %19 = tpu.matmul %17, %18, %cst_14 {dimension_numbers = #tpu.dot_dimension_numbers<[1], [0], [0], [1], [0, 0, 1, 1], [], []>} : vector<8x128xbf16>, vector<128x128xbf16>, vector<8x128xf32> -> vector<8x128xf32>
    %c0_15 = arith.constant 0 : index
    %c0_16 = arith.constant 0 : index
    %20 = vector.load %arg7[%c0_15, %c0_16] : memref<1x128xf32, #tpu.memory_space<vmem>>, vector<1x128xf32>
    %21 = vector.broadcast %20 : vector<1x128xf32> to vector<8x128xf32>
    %22 = arith.addf %19, %21 : vector<8x128xf32>
    %cst_17 = arith.constant 0.000000e+00 : f32
    %23 = vector.broadcast %cst_17 : f32 to vector<8x128xf32>
    %24 = arith.maximumf %22, %23 : vector<8x128xf32>
    %25 = arith.truncf %24 : vector<8x128xf32> to vector<8x128xbf16>
    %c0_18 = arith.constant 0 : index
    %c0_19 = arith.constant 0 : index
    %26 = vector.load %arg8[%c0_18, %c0_19] : memref<128x128xbf16, #tpu.memory_space<vmem>>, vector<128x128xbf16>
    %cst_20 = arith.constant dense<0.000000e+00> : vector<8x128xf32>
    %27 = tpu.matmul %25, %26, %cst_20 {dimension_numbers = #tpu.dot_dimension_numbers<[1], [0], [0], [1], [0, 0, 1, 1], [], []>} : vector<8x128xbf16>, vector<128x128xbf16>, vector<8x128xf32> -> vector<8x128xf32>
    %c0_21 = arith.constant 0 : index
    %c0_22 = arith.constant 0 : index
    %28 = vector.load %arg9[%c0_21, %c0_22] : memref<1x128xf32, #tpu.memory_space<vmem>>, vector<1x128xf32>
    %29 = vector.broadcast %28 : vector<1x128xf32> to vector<8x128xf32>
    %30 = arith.addf %27, %29 : vector<8x128xf32>
    %cst_23 = arith.constant 0.000000e+00 : f32
    %31 = vector.broadcast %cst_23 : f32 to vector<8x128xf32>
    %32 = arith.subf %31, %30 : vector<8x128xf32>
    %33 = math.exp %32 : vector<8x128xf32>
    %cst_24 = arith.constant 1.000000e+00 : f32
    %34 = vector.broadcast %cst_24 : f32 to vector<8x128xf32>
    %35 = arith.addf %34, %33 : vector<8x128xf32>
    %36 = tpu.reciprocal %35 {approx = true} : vector<8x128xf32> -> vector<8x128xf32>
    %c0_25 = arith.constant 0 : index
    %c0_26 = arith.constant 0 : index
    %37 = vector.load %arg10[%c0_25, %c0_26] : memref<8x128xf32, #tpu.memory_space<vmem>>, vector<8x128xf32>
    tpu.vector_store %arg10[%c0_25, %c0_26], %36 {strides = array<i32>} : memref<8x128xf32, #tpu.memory_space<vmem>>, vector<8x128xf32>,
    return
  }
  func.func @transform_0(%arg0: i32) -> (i32, i32) {
    %c0_i32 = arith.constant 0 : i32
    %c0_i32_0 = arith.constant 0 : i32
    return %arg0, %c0_i32 : i32, i32
  }
  func.func @transform_1(%arg0: i32) -> (i32, i32) {
    %c0_i32 = arith.constant 0 : i32
    %c0_i32_0 = arith.constant 0 : i32
    %c0_i32_1 = arith.constant 0 : i32
    return %c0_i32, %c0_i32_0 : i32, i32
  }
  func.func @transform_2(%arg0: i32) -> (i32, i32) {
    %c0_i32 = arith.constant 0 : i32
    %c0_i32_0 = arith.constant 0 : i32
    %c0_i32_1 = arith.constant 0 : i32
    return %c0_i32, %c0_i32_0 : i32, i32
  }
  func.func @transform_3(%arg0: i32) -> (i32, i32) {
    %c0_i32 = arith.constant 0 : i32
    %c0_i32_0 = arith.constant 0 : i32
    %c0_i32_1 = arith.constant 0 : i32
    return %c0_i32, %c0_i32_0 : i32, i32
  }
  func.func @transform_4(%arg0: i32) -> (i32, i32) {
    %c0_i32 = arith.constant 0 : i32
    %c0_i32_0 = arith.constant 0 : i32
    %c0_i32_1 = arith.constant 0 : i32
    return %c0_i32, %c0_i32_0 : i32, i32
  }
  func.func @transform_5(%arg0: i32) -> (i32, i32) {
    %c0_i32 = arith.constant 0 : i32
    %c0_i32_0 = arith.constant 0 : i32
    %c0_i32_1 = arith.constant 0 : i32
    return %c0_i32, %c0_i32_0 : i32, i32
  }
  func.func @transform_6(%arg0: i32) -> (i32, i32) {
    %c0_i32 = arith.constant 0 : i32
    %c0_i32_0 = arith.constant 0 : i32
    %c0_i32_1 = arith.constant 0 : i32
    return %c0_i32, %c0_i32_0 : i32, i32
  }
  func.func @transform_7(%arg0: i32) -> (i32, i32) {
    %c0_i32 = arith.constant 0 : i32
    %c0_i32_0 = arith.constant 0 : i32
    %c0_i32_1 = arith.constant 0 : i32
    return %c0_i32, %c0_i32_0 : i32, i32
  }
  func.func @transform_8(%arg0: i32) -> (i32, i32) {
    %c0_i32 = arith.constant 0 : i32
    %c0_i32_0 = arith.constant 0 : i32
    %c0_i32_1 = arith.constant 0 : i32
    return %c0_i32, %c0_i32_0 : i32, i32
  }
  func.func @transform_9(%arg0: i32) -> (i32, i32) {
    %c0_i32 = arith.constant 0 : i32
    %c0_i32_0 = arith.constant 0 : i32
    return %arg0, %c0_i32 : i32, i32
  }
}

</mosaic_0001>

<bundles_post_ra>
// kernel: tpu_custom_call.1
= control target key start
LH: loop header
LB: loop body
LE: loop exit
PB: predicated region body
PF: predicated region fallthrough
CT: control target
= control target key end

     0   :  { %14 = vsyncpa [#allocation3], 0  ;;  %s882_s0 = inlined_call_operand.hbm [shape: f32[8,128], index: 0, kind: input, shape index: {}]   ;;  %s883_s1 = inlined_call_operand.hbm [shape: bf16[128,128], index: 1, kind: input, shape index: {}]   ;;  %s884_s2 = inlined_call_operand.vmem [shape: f32[1,128], index: 2, kind: input, shape index: {}]   ;;  %s885_s3 = inlined_call_operand.hbm [shape: bf16[128,128], index: 3, kind: input, shape index: {}]   ;;  %s886_s4 = inlined_call_operand.vmem [shape: f32[1,128], index: 4, kind: input, shape index: {}]   ;;  %s887_s5 = inlined_call_operand.hbm [shape: bf16[128,128], index: 5, kind: input, shape index: {}]   ;;  %s888_s6 = inlined_call_operand.vmem [shape: f32[1,128], index: 6, kind: input, shape index: {}]   ;;  %s889_s7 = inlined_call_operand.hbm [shape: bf16[128,128], index: 7, kind: input, shape index: {}]   ;;  %s890_s8 = inlined_call_operand.vmem [shape: f32[1,128], index: 8, kind: input, shape index: {}]   ;;  %s891_s9 = inlined_call_operand.hbm [shape: f32[8,128], index: 9, kind: output, shape index: {}]  }
   0x1   :  { %15 = vsyncpa [#allocation6], 0 }
   0x2   :  { %16 = vsyncpa [#allocation9], 0  ;;  %s33_s11 = sshll.u32 %s883_s1, 4  ;;  %s34_s11 = int_to_ptr.hbm [resolvable:$true] %s33_s11 }
   0x3   :  { %17 = vsyncpa [#allocation4], 0  ;;  %s794_s12 = smov [#allocation5]   ;;  %s63_s16 = sshll.u32 %s887_s5, 4  ;;  %s64_s16 = int_to_ptr.hbm [resolvable:$true] %s63_s16 }
   0x4   :  { %s35_s13 = sshll.u32 %s794_s12, 4  ;;  %s795_s17 = smov 64   ;;  %s36_s13 = int_to_ptr.vmem [resolvable:$true] %s35_s13 }
   0x5   :  { %s796_s18 = smov 4   ;;  %s797_s19 = smov [#allocation8]  }
   0x6   :  { %41 = dma.hbm_to_vmem [thread:$0]  %s34_s11, 1024, %s36_s13, [#allocation6], %s795_s17, %s795_s17, %s796_s18  }
   0x7   :  { %s65_s20 = sshll.u32 %s797_s19, 4  ;;  %s23_s23 = sshll.u32 %s882_s0, 4  ;;  %s66_s20 = int_to_ptr.vmem [resolvable:$true] %s65_s20  ;;  %s24_s23 = int_to_ptr.hbm [resolvable:$true] %s23_s23 }
   0x8   :  { %71 = dma.hbm_to_vmem [thread:$0]  %s64_s16, 1024, %s66_s20, [#allocation9], %s795_s17, %s795_s17, %s796_s18  }
   0x9   :  { %s48_s25 = sshll.u32 %s885_s3, 4  ;;  %s798_s26 = smov [#allocation2]   ;;  %s49_s25 = int_to_ptr.hbm [resolvable:$true] %s48_s25 }
   0xa   :  { %s25_s27 = sshll.u32 %s798_s26, 4  ;;  %s799_s5 = smov [#allocation7]   ;;  %s26_s27 = int_to_ptr.vmem [resolvable:$true] %s25_s27 }
   0xb   :  { %28 = dma.hbm_to_vmem [thread:$0]  %s24_s23, 128, %s26_s27, [#allocation3]  }
   0xc   :  { %s50_s28 = sshll.u32 %s799_s5, 4  ;;  %s78_s10 = sshll.u32 %s889_s7, 4  ;;  %s51_s28 = int_to_ptr.vmem [resolvable:$true] %s50_s28  ;;  %s79_s10 = int_to_ptr.hbm [resolvable:$true] %s78_s10 }
   0xd   :  { %56 = dma.hbm_to_vmem [thread:$0]  %s49_s25, 1024, %s51_s28, [#allocation6], %s795_s17, %s795_s17, %s796_s18  }
   0xe   :  { %s800_s0 = smov [#allocation10]  }
   0xf   :  { %s80_s11 = sshll.u32 %s800_s0, 4  ;;  %s81_s11 = int_to_ptr.vmem [resolvable:$true] %s80_s11 }
  0x10   :  { %86 = dma.hbm_to_vmem [thread:$0]  %s79_s10, 1024, %s81_s11, [#allocation9], %s795_s17, %s795_s17, %s796_s18  }
  0x11   :  { %786 = dma.done.wait [#allocation3], 128  }
  0x12   :  { %787 = vsyncadd [#allocation3], 4294967168 }
  0x13   :  { %788 = dma.done.wait [#allocation6], 2048  }
  0x14   :  { %789 = vsyncadd [#allocation6], 4294965248 }
  0x15   :  { %790 = dma.done.wait [#allocation9], 2048  }
  0x16   :  { %791 = vsyncadd [#allocation9], 4294965248  ;;  %v601_v0 = vld [vmem:[#allocation5 + $0x38] sm:$0xff]  ;;  %v600_v1 = vld [vmem:[#allocation5 + $0x30] sm:$0xff]  ;;  %s454_s19 = sshll.u32 %s891_s9, 4  ;;  %s455_s19 = int_to_ptr.hbm [resolvable:$true] %s454_s19 }
  0x17   :  { %179 = vmatpush.bf16.msra.mxu0 %v601_v0  ;;  %v609_v2 = vld [vmem:[#allocation7 + $0x38] sm:$0xff]  ;;  %v608_v3 = vld [vmem:[#allocation7 + $0x30] sm:$0xff]  ;;  %v599_v4 = vld [vmem:[#allocation5 + $0x28] sm:$0xff] }
  0x18   :  { %262 = vmatpush.bf16.msra.mxu1 %v609_v2  ;;  %v607_v5 = vld [vmem:[#allocation7 + $0x28] sm:$0xff]  ;;  %v598_v6 = vld [vmem:[#allocation5 + $0x20] sm:$0xff]  ;;  %v597_v8 = vld [vmem:[#allocation5 + $0x18] sm:$0xff] }
  0x19   :  { %v606_v7 = vld [vmem:[#allocation7 + $0x20] sm:$0xff]  ;;  %v605_v9 = vld [vmem:[#allocation7 + $0x18] sm:$0xff]  ;;  %v596_v10 = vld [vmem:[#allocation5 + $0x10] sm:$0xff] }
  0x1a   :  { %v604_v11 = vld [vmem:[#allocation7 + $0x10] sm:$0xff]  ;;  %v595_v12 = vld [vmem:[#allocation5 + $0x8] sm:$0xff]  ;;  %v594_v13 = vld [vmem:[#allocation5] sm:$0xff] }
  0x1b   :  { %180 = vmatpush.bf16.msra.mxu0 %v600_v1  ;;  %v109_v14 = vld [vmem:[#allocation2] sm:$0xff]  ;;  %v603_v16 = vld [vmem:[#allocation7 + $0x8] sm:$0xff]  ;;  %v602_v17 = vld [vmem:[#allocation7] sm:$0xff] }
  0x1c   :  { %263 = vmatpush.bf16.msra.mxu1 %v608_v3  ;;  %v110_v15 = vpack.c.bf16 %v109_v14, %v109_v14  ;;  %v617_v18 = vld [vmem:[#allocation8 + $0x38] sm:$0xff]  ;;  %v616_v19 = vld [vmem:[#allocation8 + $0x30] sm:$0xff]  ;;  %v615_v20 = vld [vmem:[#allocation8 + $0x28] sm:$0xff] }
  0x1d   :  { %345 = vmatpush.bf16.msra.mxu2 %v617_v18  ;;  %v614_v21 = vld [vmem:[#allocation8 + $0x20] sm:$0xff]  ;;  %v613_v22 = vld [vmem:[#allocation8 + $0x18] sm:$0xff]  ;;  %v612_v23 = vld [vmem:[#allocation8 + $0x10] sm:$0xff] }
  0x1e   :  { %v634_v24 = vld [vmem:[%s884_s2] ss:$0 sm:$0xff]  ;;  %v611_v30 = vld [vmem:[#allocation8 + $0x8] sm:$0xff]  ;;  %v610_v31 = vld [vmem:[#allocation8] sm:$0xff] }
  0x1f   :  { %181 = vmatpush.bf16.msra.mxu0 %v599_v4  ;;  %v625_v32 = vld [vmem:[#allocation10 + $0x38] sm:$0xff]  ;;  %v624_v33 = vld [vmem:[#allocation10 + $0x30] sm:$0xff]  ;;  %v623_v34 = vld [vmem:[#allocation10 + $0x28] sm:$0xff] }
  0x20   :  { %264 = vmatpush.bf16.msra.mxu1 %v607_v5  ;;  %428 = vmatpush.bf16.msra.mxu3 %v625_v32  ;;  %v622_v35 = vld [vmem:[#allocation10 + $0x20] sm:$0xff]  ;;  %v621_v36 = vld [vmem:[#allocation10 + $0x18] sm:$0xff]  ;;  %v620_v37 = vld [vmem:[#allocation10 + $0x10] sm:$0xff] }
  0x21   :  { %346 = vmatpush.bf16.msra.mxu2 %v616_v19  ;;  %v635_v38 = vld [vmem:[%s886_s4] ss:$0 sm:$0xff]  ;;  %v619_v44 = vld [vmem:[#allocation10 + $0x8] sm:$0xff]  ;;  %v618_v45 = vld [vmem:[#allocation10] sm:$0xff] }
  0x22   :  { %v636_v46 = vld [vmem:[%s888_s6] ss:$0 sm:$0xff]  ;;  %s801_s6 = smov [#allocation11]  }
  0x23   :  { %182 = vmatpush.bf16.msra.mxu0 %v598_v6  ;;  %v637_v52 = vld [vmem:[%s890_s8] ss:$0 sm:$0xff]  ;;  %s452_s16 = sshll.u32 %s801_s6, 4  ;;  %s453_s16 = int_to_ptr.vmem [resolvable:$true] %s452_s16 }
  0x24   :  { %265 = vmatpush.bf16.msra.mxu1 %v606_v7  ;;  %429 = vmatpush.bf16.msra.mxu3 %v624_v33 }
  0x25   :  { %347 = vmatpush.bf16.msra.mxu2 %v615_v20 }
  0x27   :  { %183 = vmatpush.bf16.msra.mxu0 %v597_v8 }
  0x28   :  { %266 = vmatpush.bf16.msra.mxu1 %v605_v9  ;;  %430 = vmatpush.bf16.msra.mxu3 %v623_v34 }
  0x29   :  { %348 = vmatpush.bf16.msra.mxu2 %v614_v21 }
  0x2b   :  { %184 = vmatpush.bf16.msra.mxu0 %v596_v10 }
  0x2c   :  { %267 = vmatpush.bf16.msra.mxu1 %v604_v11  ;;  %431 = vmatpush.bf16.msra.mxu3 %v622_v35 }
  0x2d   :  { %349 = vmatpush.bf16.msra.mxu2 %v613_v22 }
  0x2f   :  { %185 = vmatpush.bf16.msra.mxu0 %v595_v12 }
  0x30   :  { %268 = vmatpush.bf16.msra.mxu1 %v603_v16  ;;  %432 = vmatpush.bf16.msra.mxu3 %v621_v36 }
  0x31   :  { %350 = vmatpush.bf16.msra.mxu2 %v612_v23 }
  0x33   :  { %186 = vmatpush.bf16.msra.mxu0 %v594_v13 }
  0x34   :  { %269 = vmatpush.bf16.msra.mxu1 %v602_v17  ;;  %433 = vmatpush.bf16.msra.mxu3 %v620_v37 }
  0x35   :  { %351 = vmatpush.bf16.msra.mxu2 %v611_v30 }
  0x36   :  { %187 = vmatmul.bf16.vlgmr.msra.gmra.mxu0 %v110_v15 }
  0x38   :  { %434 = vmatpush.bf16.msra.mxu3 %v619_v44 }
  0x39   :  { %352 = vmatpush.bf16.msra.mxu2 %v610_v31 }
  0x3c   :  { %435 = vmatpush.bf16.msra.mxu3 %v618_v45 }
  0xb3   :  { %v188_v25 = vpop.f32.mrf.mxu0 }
  0xb4   :  { %v189_v26 = vadd.f32 %v634_v24, %v188_v25 }
  0xb6   :  { %v192_v27 = vmax.f32 %v189_v26, 0.0 }
  0xb8   :  { %v193_v28 = vpack.c.bf16 %v192_v27, %v192_v27 }
  0xba   :  { %270 = vmatmul.bf16.vlgmr.msra.gmra.mxu1 %v193_v28 }
  0xbb   :  { %v190_v29 = vpop.f32.mrf.mxu0 }
 0x137   :  { %v271_v39 = vpop.f32.mrf.mxu1 }
 0x138   :  { %v272_v40 = vadd.f32 %v635_v38, %v271_v39 }
 0x13a   :  { %v275_v41 = vmax.f32 %v272_v40, 0.0 }
 0x13c   :  { %v276_v42 = vpack.c.bf16 %v275_v41, %v275_v41 }
 0x13e   :  { %353 = vmatmul.bf16.vlgmr.msra.gmra.mxu2 %v276_v42 }
 0x13f   :  { %v273_v43 = vpop.f32.mrf.mxu1 }
 0x1c1   :  { %v354_v47 = vpop.f32.mrf.mxu2 }
 0x1c2   :  { %v355_v48 = vadd.f32 %v636_v46, %v354_v47 }
 0x1c4   :  { %v358_v49 = vmax.f32 %v355_v48, 0.0 }
 0x1c6   :  { %v359_v50 = vpack.c.bf16 %v358_v49, %v358_v49 }
 0x1c8   :  { %436 = vmatmul.bf16.vlgmr.msra.gmra.mxu3 %v359_v50 }
 0x1c9   :  { %v356_v51 = vpop.f32.mrf.mxu2 }
 0x24b   :  { %v437_v53 = vpop.f32.mrf.mxu3 }
 0x24c   :  { %v438_v54 = vadd.f32 %v637_v52, %v437_v53 }
 0x24e   :  { %v441_v55 = vsub.f32 0.0, %v438_v54 }
 0x250   :  { %v442_v56 = vmul.f32 1.442695, %v441_v55 }
 0x252   :  { %638 = vpow2.f32 %v442_v56 }
 0x253   :  { %v439_v57 = vpop.f32.mrf.mxu3 }
 0x258   :  { %v639_v58 = vpop.eup %638 }
 0x259   :  { %v444_v59 = vadd.f32 1.0, %v639_v58 }
 0x25b   :  { %640 = vrcp.f32 %v444_v59 }
 0x261   :  { %v641_v60 = vpop.eup %640 }
 0x262   :  { %446 = vst [vmem:[#allocation11] sm:$0xff] %v641_v60 }
 0x263   :  { %457 = dma.vmem_to_hbm [thread:$0]  %s453_s16, 128, %s455_s19, [#allocation4]  }
 0x264   :  { %792 = dma.done.wait [#allocation4], 128  }
 0x265   :  { %793 = vsyncadd [#allocation4], 4294967168 }
 0x266   :  { %462 = vsyncpa [#allocation3], 1 }
 0x267   :  { %463 = vsyncpa [#allocation6], 1 }
 0x268   :  { %464 = vsyncpa [#allocation9], 1 }
 0x269   :  { %465 = vsyncpa [#allocation4], 1 }

// kernel: tpu_custom_call.1
= control target key start
LH: loop header
LB: loop body
LE: loop exit
PB: predicated region body
PF: predicated region fallthrough
CT: control target
= control target key end

     0   :  { %14 = vsyncpa [#allocation3], 0  ;;  %s882_s0 = inlined_call_operand.hbm [shape: f32[8,128], index: 0, kind: input, shape index: {}]   ;;  %s883_s1 = inlined_call_operand.hbm [shape: bf16[128,128], index: 1, kind: input, shape index: {}]   ;;  %s884_s2 = inlined_call_operand.vmem [shape: f32[1,128], index: 2, kind: input, shape index: {}]   ;;  %s885_s3 = inlined_call_operand.hbm [shape: bf16[128,128], index: 3, kind: input, shape index: {}]   ;;  %s886_s4 = inlined_call_operand.vmem [shape: f32[1,128], index: 4, kind: input, shape index: {}]   ;;  %s887_s5 = inlined_call_operand.hbm [shape: bf16[128,128], index: 5, kind: input, shape index: {}]   ;;  %s888_s6 = inlined_call_operand.vmem [shape: f32[1,128], index: 6, kind: input, shape index: {}]   ;;  %s889_s7 = inlined_call_operand.hbm [shape: bf16[128,128], index: 7, kind: input, shape index: {}]   ;;  %s890_s8 = inlined_call_operand.vmem [shape: f32[1,128], index: 8, kind: input, shape index: {}]   ;;  %s891_s9 = inlined_call_operand.hbm [shape: f32[8,128], index: 9, kind: output, shape index: {}]  }
   0x1   :  { %15 = vsyncpa [#allocation6], 0 }
   0x2   :  { %16 = vsyncpa [#allocation9], 0  ;;  %s33_s11 = sshll.u32 %s883_s1, 4  ;;  %s34_s11 = int_to_ptr.hbm [resolvable:$true] %s33_s11 }
   0x3   :  { %17 = vsyncpa [#allocation4], 0  ;;  %s794_s12 = smov [#allocation5]   ;;  %s63_s16 = sshll.u32 %s887_s5, 4  ;;  %s64_s16 = int_to_ptr.hbm [resolvable:$true] %s63_s16 }
   0x4   :  { %s35_s13 = sshll.u32 %s794_s12, 4  ;;  %s795_s17 = smov 64   ;;  %s36_s13 = int_to_ptr.vmem [resolvable:$true] %s35_s13 }
   0x5   :  { %s796_s18 = smov 4   ;;  %s797_s19 = smov [#allocation8]  }
   0x6   :  { %41 = dma.hbm_to_vmem [thread:$0]  %s34_s11, 1024, %s36_s13, [#allocation6], %s795_s17, %s795_s17, %s796_s18  }
   0x7   :  { %s65_s20 = sshll.u32 %s797_s19, 4  ;;  %s23_s23 = sshll.u32 %s882_s0, 4  ;;  %s66_s20 = int_to_ptr.vmem [resolvable:$true] %s65_s20  ;;  %s24_s23 = int_to_ptr.hbm [resolvable:$true] %s23_s23 }
   0x8   :  { %71 = dma.hbm_to_vmem [thread:$0]  %s64_s16, 1024, %s66_s20, [#allocation9], %s795_s17, %s795_s17, %s796_s18  }
   0x9   :  { %s48_s25 = sshll.u32 %s885_s3, 4  ;;  %s798_s26 = smov [#allocation2]   ;;  %s49_s25 = int_to_ptr.hbm [resolvable:$true] %s48_s25 }
   0xa   :  { %s25_s27 = sshll.u32 %s798_s26, 4  ;;  %s799_s5 = smov [#allocation7]   ;;  %s26_s27 = int_to_ptr.vmem [resolvable:$true] %s25_s27 }
   0xb   :  { %28 = dma.hbm_to_vmem [thread:$0]  %s24_s23, 128, %s26_s27, [#allocation3]  }
   0xc   :  { %s50_s28 = sshll.u32 %s799_s5, 4  ;;  %s78_s10 = sshll.u32 %s889_s7, 4  ;;  %s51_s28 = int_to_ptr.vmem [resolvable:$true] %s50_s28  ;;  %s79_s10 = int_to_ptr.hbm [resolvable:$true] %s78_s10 }
   0xd   :  { %56 = dma.hbm_to_vmem [thread:$0]  %s49_s25, 1024, %s51_s28, [#allocation6], %s795_s17, %s795_s17, %s796_s18  }
   0xe   :  { %s800_s0 = smov [#allocation10]  }
   0xf   :  { %s80_s11 = sshll.u32 %s800_s0, 4  ;;  %s81_s11 = int_to_ptr.vmem [resolvable:$true] %s80_s11 }
  0x10   :  { %86 = dma.hbm_to_vmem [thread:$0]  %s79_s10, 1024, %s81_s11, [#allocation9], %s795_s17, %s795_s17, %s796_s18  }
  0x11   :  { %786 = dma.done.wait [#allocation3], 128  }
  0x12   :  { %787 = vsyncadd [#allocation3], 4294967168 }
  0x13   :  { %788 = dma.done.wait [#allocation6], 2048  }
  0x14   :  { %789 = vsyncadd [#allocation6], 4294965248 }
  0x15   :  { %790 = dma.done.wait [#allocation9], 2048  }
  0x16   :  { %791 = vsyncadd [#allocation9], 4294965248  ;;  %v601_v0 = vld [vmem:[#allocation5 + $0x38] sm:$0xff]  ;;  %v600_v1 = vld [vmem:[#allocation5 + $0x30] sm:$0xff]  ;;  %s454_s19 = sshll.u32 %s891_s9, 4  ;;  %s455_s19 = int_to_ptr.hbm [resolvable:$true] %s454_s19 }
  0x17   :  { %179 = vmatpush.bf16.msra.mxu0 %v601_v0  ;;  %v609_v2 = vld [vmem:[#allocation7 + $0x38] sm:$0xff]  ;;  %v608_v3 = vld [vmem:[#allocation7 + $0x30] sm:$0xff]  ;;  %v599_v4 = vld [vmem:[#allocation5 + $0x28] sm:$0xff] }
  0x18   :  { %262 = vmatpush.bf16.msra.mxu1 %v609_v2  ;;  %v607_v5 = vld [vmem:[#allocation7 + $0x28] sm:$0xff]  ;;  %v598_v6 = vld [vmem:[#allocation5 + $0x20] sm:$0xff]  ;;  %v597_v8 = vld [vmem:[#allocation5 + $0x18] sm:$0xff] }
  0x19   :  { %v606_v7 = vld [vmem:[#allocation7 + $0x20] sm:$0xff]  ;;  %v605_v9 = vld [vmem:[#allocation7 + $0x18] sm:$0xff]  ;;  %v596_v10 = vld [vmem:[#allocation5 + $0x10] sm:$0xff] }
  0x1a   :  { %v604_v11 = vld [vmem:[#allocation7 + $0x10] sm:$0xff]  ;;  %v595_v12 = vld [vmem:[#allocation5 + $0x8] sm:$0xff]  ;;  %v594_v13 = vld [vmem:[#allocation5] sm:$0xff] }
  0x1b   :  { %180 = vmatpush.bf16.msra.mxu0 %v600_v1  ;;  %v109_v14 = vld [vmem:[#allocation2] sm:$0xff]  ;;  %v603_v16 = vld [vmem:[#allocation7 + $0x8] sm:$0xff]  ;;  %v602_v17 = vld [vmem:[#allocation7] sm:$0xff] }
  0x1c   :  { %263 = vmatpush.bf16.msra.mxu1 %v608_v3  ;;  %v110_v15 = vpack.c.bf16 %v109_v14, %v109_v14  ;;  %v617_v18 = vld [vmem:[#allocation8 + $0x38] sm:$0xff]  ;;  %v616_v19 = vld [vmem:[#allocation8 + $0x30] sm:$0xff]  ;;  %v615_v20 = vld [vmem:[#allocation8 + $0x28] sm:$0xff] }
  0x1d   :  { %345 = vmatpush.bf16.msra.mxu2 %v617_v18  ;;  %v614_v21 = vld [vmem:[#allocation8 + $0x20] sm:$0xff]  ;;  %v613_v22 = vld [vmem:[#allocation8 + $0x18] sm:$0xff]  ;;  %v612_v23 = vld [vmem:[#allocation8 + $0x10] sm:$0xff] }
  0x1e   :  { %v634_v24 = vld [vmem:[%s884_s2] ss:$0 sm:$0xff]  ;;  %v611_v30 = vld [vmem:[#allocation8 + $0x8] sm:$0xff]  ;;  %v610_v31 = vld [vmem:[#allocation8] sm:$0xff] }
  0x1f   :  { %181 = vmatpush.bf16.msra.mxu0 %v599_v4  ;;  %v625_v32 = vld [vmem:[#allocation10 + $0x38] sm:$0xff]  ;;  %v624_v33 = vld [vmem:[#allocation10 + $0x30] sm:$0xff]  ;;  %v623_v34 = vld [vmem:[#allocation10 + $0x28] sm:$0xff] }
  0x20   :  { %264 = vmatpush.bf16.msra.mxu1 %v607_v5  ;;  %428 = vmatpush.bf16.msra.mxu3 %v625_v32  ;;  %v622_v35 = vld [vmem:[#allocation10 + $0x20] sm:$0xff]  ;;  %v621_v36 = vld [vmem:[#allocation10 + $0x18] sm:$0xff]  ;;  %v620_v37 = vld [vmem:[#allocation10 + $0x10] sm:$0xff] }
  0x21   :  { %346 = vmatpush.bf16.msra.mxu2 %v616_v19  ;;  %v635_v38 = vld [vmem:[%s886_s4] ss:$0 sm:$0xff]  ;;  %v619_v44 = vld [vmem:[#allocation10 + $0x8] sm:$0xff]  ;;  %v618_v45 = vld [vmem:[#allocation10] sm:$0xff] }
  0x22   :  { %v636_v46 = vld [vmem:[%s888_s6] ss:$0 sm:$0xff]  ;;  %s801_s6 = smov [#allocation11]  }
  0x23   :  { %182 = vmatpush.bf16.msra.mxu0 %v598_v6  ;;  %v637_v52 = vld [vmem:[%s890_s8] ss:$0 sm:$0xff]  ;;  %s452_s16 = sshll.u32 %s801_s6, 4  ;;  %s453_s16 = int_to_ptr.vmem [resolvable:$true] %s452_s16 }
  0x24   :  { %265 = vmatpush.bf16.msra.mxu1 %v606_v7  ;;  %429 = vmatpush.bf16.msra.mxu3 %v624_v33 }
  0x25   :  { %347 = vmatpush.bf16.msra.mxu2 %v615_v20 }
  0x27   :  { %183 = vmatpush.bf16.msra.mxu0 %v597_v8 }
  0x28   :  { %266 = vmatpush.bf16.msra.mxu1 %v605_v9  ;;  %430 = vmatpush.bf16.msra.mxu3 %v623_v34 }
  0x29   :  { %348 = vmatpush.bf16.msra.mxu2 %v614_v21 }
  0x2b   :  { %184 = vmatpush.bf16.msra.mxu0 %v596_v10 }
  0x2c   :  { %267 = vmatpush.bf16.msra.mxu1 %v604_v11  ;;  %431 = vmatpush.bf16.msra.mxu3 %v622_v35 }
  0x2d   :  { %349 = vmatpush.bf16.msra.mxu2 %v613_v22 }
  0x2f   :  { %185 = vmatpush.bf16.msra.mxu0 %v595_v12 }
  0x30   :  { %268 = vmatpush.bf16.msra.mxu1 %v603_v16  ;;  %432 = vmatpush.bf16.msra.mxu3 %v621_v36 }
  0x31   :  { %350 = vmatpush.bf16.msra.mxu2 %v612_v23 }
  0x33   :  { %186 = vmatpush.bf16.msra.mxu0 %v594_v13 }
  0x34   :  { %269 = vmatpush.bf16.msra.mxu1 %v602_v17  ;;  %433 = vmatpush.bf16.msra.mxu3 %v620_v37 }
  0x35   :  { %351 = vmatpush.bf16.msra.mxu2 %v611_v30 }
  0x36   :  { %187 = vmatmul.bf16.vlgmr.msra.gmra.mxu0 %v110_v15 }
  0x38   :  { %434 = vmatpush.bf16.msra.mxu3 %v619_v44 }
  0x39   :  { %352 = vmatpush.bf16.msra.mxu2 %v610_v31 }
  0x3c   :  { %435 = vmatpush.bf16.msra.mxu3 %v618_v45 }
  0xb3   :  { %v188_v25 = vpop.f32.mrf.mxu0 }
  0xb4   :  { %v189_v26 = vadd.f32 %v634_v24, %v188_v25 }
  0xb6   :  { %v192_v27 = vmax.f32 %v189_v26, 0.0 }
  0xb8   :  { %v193_v28 = vpack.c.bf16 %v192_v27, %v192_v27 }
  0xba   :  { %270 = vmatmul.bf16.vlgmr.msra.gmra.mxu1 %v193_v28 }
  0xbb   :  { %v190_v29 = vpop.f32.mrf.mxu0 }
 0x137   :  { %v271_v39 = vpop.f32.mrf.mxu1 }
 0x138   :  { %v272_v40 = vadd.f32 %v635_v38, %v271_v39 }
 0x13a   :  { %v275_v41 = vmax.f32 %v272_v40, 0.0 }
 0x13c   :  { %v276_v42 = vpack.c.bf16 %v275_v41, %v275_v41 }
 0x13e   :  { %353 = vmatmul.bf16.vlgmr.msra.gmra.mxu2 %v276_v42 }
 0x13f   :  { %v273_v43 = vpop.f32.mrf.mxu1 }
 0x1c1   :  { %v354_v47 = vpop.f32.mrf.mxu2 }
 0x1c2   :  { %v355_v48 = vadd.f32 %v636_v46, %v354_v47 }
 0x1c4   :  { %v358_v49 = vmax.f32 %v355_v48, 0.0 }
 0x1c6   :  { %v359_v50 = vpack.c.bf16 %v358_v49, %v358_v49 }
 0x1c8   :  { %436 = vmatmul.bf16.vlgmr.msra.gmra.mxu3 %v359_v50 }
 0x1c9   :  { %v356_v51 = vpop.f32.mrf.mxu2 }
 0x24b   :  { %v437_v53 = vpop.f32.mrf.mxu3 }
 0x24c   :  { %v438_v54 = vadd.f32 %v637_v52, %v437_v53 }
 0x24e   :  { %v441_v55 = vsub.f32 0.0, %v438_v54 }
 0x250   :  { %v442_v56 = vmul.f32 1.442695, %v441_v55 }
 0x252   :  { %638 = vpow2.f32 %v442_v56 }
 0x253   :  { %v439_v57 = vpop.f32.mrf.mxu3 }
 0x258   :  { %v639_v58 = vpop.eup %638 }
 0x259   :  { %v444_v59 = vadd.f32 1.0, %v639_v58 }
 0x25b   :  { %640 = vrcp.f32 %v444_v59 }
 0x261   :  { %v641_v60 = vpop.eup %640 }
 0x262   :  { %446 = vst [vmem:[#allocation11] sm:$0xff] %v641_v60 }
 0x263   :  { %457 = dma.vmem_to_hbm [thread:$0]  %s453_s16, 128, %s455_s19, [#allocation4]  }
 0x264   :  { %792 = dma.done.wait [#allocation4], 128  }
 0x265   :  { %793 = vsyncadd [#allocation4], 4294967168 }
 0x266   :  { %462 = vsyncpa [#allocation3], 1 }
 0x267   :  { %463 = vsyncpa [#allocation6], 1 }
 0x268   :  { %464 = vsyncpa [#allocation9], 1 }
 0x269   :  { %465 = vsyncpa [#allocation4], 1 }

</bundles_post_ra>
